<compile_context>
chip_gen: v5e
topology: v5e:2x2
jax: 0.10.0
libtpu: 0.0.40
codegen_flags: <defaults>
</compile_context>

<pallas_src>
import jax
import jax.numpy as jnp
from jax.experimental import pallas as pl
from jax.experimental.pallas import tpu as pltpu

# ---------------- small config, consistent with the module ----------------
VOCAB = 100        # config.vocab_size
HIDDEN = 64        # config.hidden_size
MAX_POS = 32       # config.max_position_embeddings (>= SEQ + 2)
TYPE_VOCAB = 2     # config.type_vocab_size
PAD_ID = 1         # config.pad_token_id (padding_idx of word embeddings)
LN_EPS = 1e-5      # config.layer_norm_eps
BATCH = 2
SEQ = 16


# ---------------- fused Pallas forward ----------------
def roberta_embeddings(params, input_ids):
    B, S = input_ids.shape
    V, H = params["word_emb"].shape
    P = params["pos_emb"].shape[0]
    T = params["type_emb"].shape[0]
    BS = B * S
    ids_2d = input_ids.reshape(BS, 1).astype(jnp.int32)

    def kernel(ids_ref, word_ref, pos_ref, type_ref, g_ref, b_ref, o_ref):
        ids = ids_ref[...]                                            # (BS, 1) int32

        # -- word embedding lookup: one-hot @ table on the MXU (exact: rows are one-hot)
        vocab_iota = jax.lax.broadcasted_iota(jnp.int32, (BS, V), 1)
        word_1h = (vocab_iota == ids).astype(jnp.float32)             # (BS, V)
        word = jnp.dot(word_1h, word_ref[...],
                       preferred_element_type=jnp.float32)            # (BS, H)

        # -- position embeddings: position_ids = arange(2, S + 2) for every batch row.
        #    Rows of the flattened slab are batch-major, so position = 2 + (row % S).
        pos_iota = jax.lax.broadcasted_iota(jnp.int32, (BS, P), 1)
        row_iota = jax.lax.broadcasted_iota(jnp.int32, (BS, P), 0)
        pos_ids = (row_iota % S) + 2
        pos_1h = (pos_iota == pos_ids).astype(jnp.float32)            # (BS, P)
        pos = jnp.dot(pos_1h, pos_ref[...],
                      preferred_element_type=jnp.float32)             # (BS, H)

        # -- token_type_ids are all zeros -> row 0 of the type table, broadcast over rows
        tok = type_ref[0:1, :]                                        # (1, H)

        emb = word + pos + tok                                        # (BS, H) f32

        # -- LayerNorm in f32 (rsqrt -> EUP slot)
        mu = jnp.mean(emb, axis=-1, keepdims=True)
        var = jnp.mean((emb - mu) ** 2, axis=-1, keepdims=True)
        o_ref[...] = (emb - mu) * jax.lax.rsqrt(var + LN_EPS) * g_ref[...] + b_ref[...]
        # dropout: identity in eval-mode forward

    out = pl.pallas_call(
        kernel,
        out_shape=jax.ShapeDtypeStruct((BS, H), jnp.float32),
        grid=(1,),
        in_specs=[
            pl.BlockSpec((BS, 1), lambda i: (0, 0)),   # token ids
            pl.BlockSpec((V, H), lambda i: (0, 0)),    # word embedding table
            pl.BlockSpec((P, H), lambda i: (0, 0)),    # position embedding table
            pl.BlockSpec((T, H), lambda i: (0, 0)),    # token-type embedding table
            pl.BlockSpec((1, H), lambda i: (0, 0)),    # LN gamma
            pl.BlockSpec((1, H), lambda i: (0, 0)),    # LN beta
        ],
        out_specs=pl.BlockSpec((BS, H), lambda i: (0, 0)),
        compiler_params=pltpu.CompilerParams(dimension_semantics=("arbitrary",)),
    )(ids_2d, params["word_emb"], params["pos_emb"], params["type_emb"],
      params["ln_g"], params["ln_b"])

    return out.reshape(B, S, H)


# ---------------- pure-JAX reference (for correctness check) ----------------
def reference_embeddings(params, input_ids):
    B, S = input_ids.shape
    word = jnp.take(params["word_emb"], input_ids, axis=0)
    pos = jnp.take(params["pos_emb"],
                   jnp.arange(2, S + 2, dtype=jnp.int32), axis=0)[None, :, :]
    tok = params["type_emb"][0][None, None, :]
    emb = word + pos + tok
    mu = jnp.mean(emb, axis=-1, keepdims=True)
    var = jnp.mean((emb - mu) ** 2, axis=-1, keepdims=True)
    return (emb - mu) * jax.lax.rsqrt(var + LN_EPS) * params["ln_g"] + params["ln_b"]


# ---------------- deterministic parameter init ----------------
def init_params(key):
    k_word, k_pos, k_type = jax.random.split(key, 3)

    def normal(k, shape, scale=0.02):
        return (scale * jax.random.normal(k, shape)).astype(jnp.float32)

    word_emb = normal(k_word, (VOCAB, HIDDEN)).at[PAD_ID].set(0.0)  # padding_idx row
    return {
        "word_emb": word_emb,
        "pos_emb": normal(k_pos, (MAX_POS, HIDDEN)),
        "type_emb": normal(k_type, (TYPE_VOCAB, HIDDEN)),
        "ln_g": jnp.ones((1, HIDDEN), jnp.float32),
        "ln_b": jnp.zeros((1, HIDDEN), jnp.float32),
    }


if __name__ == "__main__":
    key = jax.random.PRNGKey(0)
    k_param, k_ids = jax.random.split(key)
    params = init_params(k_param)

    input_ids = jax.random.randint(k_ids, (BATCH, SEQ), 0, VOCAB, dtype=jnp.int32)

    out = jax.jit(roberta_embeddings)(params, input_ids)
    jax.block_until_ready(out)

    ref = reference_embeddings(params, input_ids)
    assert out.shape == (BATCH, SEQ, HIDDEN)
    assert bool(jnp.all(jnp.isfinite(out)))
    assert bool(jnp.allclose(out, ref, atol=1e-2, rtol=1e-2))
    print("KERNEL_OK")
</pallas_src>

<mosaic_0001>
module attributes {stable_mosaic.version = 11 : i64} {
  func.func @kernel(%arg0: i32, %arg1: memref<32x1xi32, #tpu.memory_space<vmem>>, %arg2: memref<100x64xf32, #tpu.memory_space<vmem>>, %arg3: memref<32x64xf32, #tpu.memory_space<vmem>>, %arg4: memref<2x64xf32, #tpu.memory_space<vmem>>, %arg5: memref<1x64xf32, #tpu.memory_space<vmem>>, %arg6: memref<1x64xf32, #tpu.memory_space<vmem>>, %arg7: memref<32x64xf32, #tpu.memory_space<vmem>>) attributes {dimension_semantics = [#tpu.dimension_semantics<arbitrary>], iteration_bounds = array<i64: 1>, scalar_prefetch = 0 : i64, scratch_operands = 0 : i64, tpu.core_type = #tpu.core_type<tc>, window_params = [{pipeline_mode = #tpu.pipeline_mode<synchronous>, transform_indices = @transform_0, window_bounds = array<i64: 32, 1>}, {pipeline_mode = #tpu.pipeline_mode<synchronous>, transform_indices = @transform_1, window_bounds = array<i64: 100, 64>}, {pipeline_mode = #tpu.pipeline_mode<synchronous>, transform_indices = @transform_2, window_bounds = array<i64: 32, 64>}, {pipeline_mode = #tpu.pipeline_mode<synchronous>, transform_indices = @transform_3, window_bounds = array<i64: 2, 64>}, {pipeline_mode = #tpu.pipeline_mode<synchronous>, transform_indices = @transform_4, window_bounds = array<i64: 1, 64>}, {pipeline_mode = #tpu.pipeline_mode<synchronous>, transform_indices = @transform_5, window_bounds = array<i64: 1, 64>}, {pipeline_mode = #tpu.pipeline_mode<synchronous>, transform_indices = @transform_6, window_bounds = array<i64: 32, 64>}]} {
    %c0 = arith.constant 0 : index
    %c0_0 = arith.constant 0 : index
    %0 = vector.load %arg1[%c0, %c0_0] : memref<32x1xi32, #tpu.memory_space<vmem>>, vector<32x1xi32>
    %1 = tpu.iota {dimensions = array<i32: 1>} : vector<32x100xi32>
    %2 = vector.broadcast %0 : vector<32x1xi32> to vector<32x100xi32>
    %3 = arith.cmpi eq, %1, %2 : vector<32x100xi32>
    %4 = arith.extui %3 : vector<32x100xi1> to vector<32x100xi32>
    %5 = arith.sitofp %4 : vector<32x100xi32> to vector<32x100xf32>
    %c0_1 = arith.constant 0 : index
    %c0_2 = arith.constant 0 : index
    %6 = vector.load %arg2[%c0_1, %c0_2] : memref<100x64xf32, #tpu.memory_space<vmem>>, vector<100x64xf32>
    %cst = arith.constant dense<0.000000e+00> : vector<32x64xf32>
    %7 = tpu.matmul %5, %6, %cst {dimension_numbers = #tpu.dot_dimension_numbers<[1], [0], [0], [1], [0, 0, 1, 1], [], []>} : vector<32x100xf32>, vector<100x64xf32>, vector<32x64xf32> -> vector<32x64xf32>
    %8 = tpu.iota {dimensions = array<i32: 1>} : vector<32x32xi32>
    %9 = tpu.iota {dimensions = array<i32: 0>} : vector<32x32xi32>
    %c16_i32 = arith.constant 16 : i32
    %c0_i32 = arith.constant 0 : i32
    %10 = arith.cmpi eq, %c16_i32, %c0_i32 : i32
    %c1_i32 = arith.constant 1 : i32
    %11 = arith.select %10, %c1_i32, %c16_i32 : i32
    %12 = vector.broadcast %11 : i32 to vector<32x32xi32>
    %13 = arith.remsi %9, %12 : vector<32x32xi32>
    %c0_i32_3 = arith.constant 0 : i32
    %14 = vector.broadcast %c0_i32_3 : i32 to vector<32x32xi32>
    %15 = arith.cmpi ne, %13, %14 : vector<32x32xi32>
    %c0_i32_4 = arith.constant 0 : i32
    %16 = vector.broadcast %c0_i32_4 : i32 to vector<32x32xi32>
    %17 = arith.cmpi slt, %13, %16 : vector<32x32xi32>
    %c0_i32_5 = arith.constant 0 : i32
    %18 = arith.cmpi slt, %11, %c0_i32_5 : i32
    %19 = vector.broadcast %18 : i1 to vector<32x32xi1>
    %20 = vector.broadcast %19 : vector<32x32xi1> to vector<32x32xi1>
    %21 = arith.xori %17, %20 : vector<32x32xi1>
    %22 = arith.andi %21, %15 : vector<32x32xi1>
    %23 = vector.broadcast %11 : i32 to vector<32x32xi32>
    %24 = arith.addi %13, %23 : vector<32x32xi32>
    %25 = arith.select %22, %24, %13 : vector<32x32xi1>, vector<32x32xi32>
    %c2_i32 = arith.constant 2 : i32
    %26 = vector.broadcast %c2_i32 : i32 to vector<32x32xi32>
    %27 = arith.addi %25, %26 : vector<32x32xi32>
    %28 = arith.cmpi eq, %8, %27 : vector<32x32xi32>
    %29 = arith.extui %28 : vector<32x32xi1> to vector<32x32xi32>
    %30 = arith.sitofp %29 : vector<32x32xi32> to vector<32x32xf32>
    %c0_6 = arith.constant 0 : index
    %c0_7 = arith.constant 0 : index
    %31 = vector.load %arg3[%c0_6, %c0_7] : memref<32x64xf32, #tpu.memory_space<vmem>>, vector<32x64xf32>
    %cst_8 = arith.constant dense<0.000000e+00> : vector<32x64xf32>
    %32 = tpu.matmul %30, %31, %cst_8 {dimension_numbers = #tpu.dot_dimension_numbers<[1], [0], [0], [1], [0, 0, 1, 1], [], []>} : vector<32x32xf32>, vector<32x64xf32>, vector<32x64xf32> -> vector<32x64xf32>
    %c0_9 = arith.constant 0 : index
    %c0_10 = arith.constant 0 : index
    %33 = vector.load %arg4[%c0_9, %c0_10] : memref<2x64xf32, #tpu.memory_space<vmem>>, vector<1x64xf32>
    %34 = arith.addf %7, %32 : vector<32x64xf32>
    %35 = vector.broadcast %33 : vector<1x64xf32> to vector<32x64xf32>
    %36 = arith.addf %34, %35 : vector<32x64xf32>
    %cst_11 = arith.constant dense<0.000000e+00> : vector<32xf32>
    %37 = vector.multi_reduction <add>, %36, %cst_11 [1] : vector<32x64xf32> to vector<32xf32>
    %38 = vector.shape_cast %37 : vector<32xf32> to vector<32x1xf32>
    %cst_12 = arith.constant 6.400000e+01 : f32
    %39 = vector.broadcast %cst_12 : f32 to vector<32x1xf32>
    %40 = arith.divf %38, %39 : vector<32x1xf32>
    %41 = vector.broadcast %40 : vector<32x1xf32> to vector<32x64xf32>
    %42 = arith.subf %36, %41 : vector<32x64xf32>
    %43 = arith.mulf %42, %42 : vector<32x64xf32>
    %cst_13 = arith.constant dense<0.000000e+00> : vector<32xf32>
    %44 = vector.multi_reduction <add>, %43, %cst_13 [1] : vector<32x64xf32> to vector<32xf32>
    %45 = vector.shape_cast %44 : vector<32xf32> to vector<32x1xf32>
    %cst_14 = arith.constant 6.400000e+01 : f32
    %46 = vector.broadcast %cst_14 : f32 to vector<32x1xf32>
    %47 = arith.divf %45, %46 : vector<32x1xf32>
    %48 = vector.broadcast %40 : vector<32x1xf32> to vector<32x64xf32>
    %49 = arith.subf %36, %48 : vector<32x64xf32>
    %cst_15 = arith.constant 9.99999974E-6 : f32
    %50 = vector.broadcast %cst_15 : f32 to vector<32x1xf32>
    %51 = arith.addf %47, %50 : vector<32x1xf32>
    %52 = math.rsqrt %51 : vector<32x1xf32>
    %53 = vector.broadcast %52 : vector<32x1xf32> to vector<32x64xf32>
    %54 = arith.mulf %49, %53 : vector<32x64xf32>
    %c0_16 = arith.constant 0 : index
    %c0_17 = arith.constant 0 : index
    %55 = vector.load %arg5[%c0_16, %c0_17] : memref<1x64xf32, #tpu.memory_space<vmem>>, vector<1x64xf32>
    %56 = vector.broadcast %55 : vector<1x64xf32> to vector<32x64xf32>
    %57 = arith.mulf %54, %56 : vector<32x64xf32>
    %c0_18 = arith.constant 0 : index
    %c0_19 = arith.constant 0 : index
    %58 = vector.load %arg6[%c0_18, %c0_19] : memref<1x64xf32, #tpu.memory_space<vmem>>, vector<1x64xf32>
    %59 = vector.broadcast %58 : vector<1x64xf32> to vector<32x64xf32>
    %60 = arith.addf %57, %59 : vector<32x64xf32>
    %c0_20 = arith.constant 0 : index
    %c0_21 = arith.constant 0 : index
    %61 = vector.load %arg7[%c0_20, %c0_21] : memref<32x64xf32, #tpu.memory_space<vmem>>, vector<32x64xf32>
    tpu.vector_store %arg7[%c0_20, %c0_21], %60 {strides = array<i32>} : memref<32x64xf32, #tpu.memory_space<vmem>>, vector<32x64xf32>,
    return
  }
  func.func @transform_0(%arg0: i32) -> (i32, i32) {
    %c0_i32 = arith.constant 0 : i32
    %c0_i32_0 = arith.constant 0 : i32
    %c0_i32_1 = arith.constant 0 : i32
    return %c0_i32, %c0_i32_0 : i32, i32
  }
  func.func @transform_1(%arg0: i32) -> (i32, i32) {
    %c0_i32 = arith.constant 0 : i32
    %c0_i32_0 = arith.constant 0 : i32
    %c0_i32_1 = arith.constant 0 : i32
    return %c0_i32, %c0_i32_0 : i32, i32
  }
  func.func @transform_2(%arg0: i32) -> (i32, i32) {
    %c0_i32 = arith.constant 0 : i32
    %c0_i32_0 = arith.constant 0 : i32
    %c0_i32_1 = arith.constant 0 : i32
    return %c0_i32, %c0_i32_0 : i32, i32
  }
  func.func @transform_3(%arg0: i32) -> (i32, i32) {
    %c0_i32 = arith.constant 0 : i32
    %c0_i32_0 = arith.constant 0 : i32
    %c0_i32_1 = arith.constant 0 : i32
    return %c0_i32, %c0_i32_0 : i32, i32
  }
  func.func @transform_4(%arg0: i32) -> (i32, i32) {
    %c0_i32 = arith.constant 0 : i32
    %c0_i32_0 = arith.constant 0 : i32
    %c0_i32_1 = arith.constant 0 : i32
    return %c0_i32, %c0_i32_0 : i32, i32
  }
  func.func @transform_5(%arg0: i32) -> (i32, i32) {
    %c0_i32 = arith.constant 0 : i32
    %c0_i32_0 = arith.constant 0 : i32
    %c0_i32_1 = arith.constant 0 : i32
    return %c0_i32, %c0_i32_0 : i32, i32
  }
  func.func @transform_6(%arg0: i32) -> (i32, i32) {
    %c0_i32 = arith.constant 0 : i32
    %c0_i32_0 = arith.constant 0 : i32
    %c0_i32_1 = arith.constant 0 : i32
    return %c0_i32, %c0_i32_0 : i32, i32
  }
}

</mosaic_0001>

<bundles_post_ra>
// kernel: roberta_embeddings.1
= control target key start
LH: loop header
LB: loop body
LE: loop exit
PB: predicated region body
PF: predicated region fallthrough
CT: control target
= control target key end

     0   :  { %vm196_vm0 = vcmask 1043456   ;;  %v28_v2 = vlaneseq  ;;  %v458_v3 = vmov 0   ;;  %s627_s0 = inlined_call_operand.vmem [shape: s32[32,1], index: 0, kind: input, shape index: {}]   ;;  %s628_s1 = inlined_call_operand.vmem [shape: f32[100,64], index: 1, kind: input, shape index: {}]   ;;  %s629_s2 = inlined_call_operand.vmem [shape: f32[32,64], index: 2, kind: input, shape index: {}]   ;;  %s630_s3 = inlined_call_operand.vmem [shape: f32[2,64], index: 3, kind: input, shape index: {}]   ;;  %s631_s4 = inlined_call_operand.vmem [shape: f32[1,64], index: 4, kind: input, shape index: {}]   ;;  %s632_s5 = inlined_call_operand.vmem [shape: f32[1,64], index: 5, kind: input, shape index: {}]   ;;  %s633_s6 = inlined_call_operand.hbm [shape: f32[32,64], index: 6, kind: output, shape index: {}]  }
   0x1   :  { %v27_v0 = vld [vmem:[%s627_s0 + $0x18] sm:$0xff]  ;;  %v26_v1 = vld [vmem:[%s627_s0 + $0x10] sm:$0xff]  ;;  %418 = vset.pattern.permute.xlu1 %v458_v3  ;;  %417 = vset.pattern.permute.xlu0 %v458_v3  ;;  %v66_v4 = vld [vmem:[%s628_s1 + $0x60] sm:$0xf] }
   0x2   :  { %40 = vperm.xlu1 %418, %v27_v0   ;;  %37 = vperm.xlu0 %417, %v26_v1   ;;  %v65_v5 = vld [vmem:[%s628_s1 + $0x58] sm:$0xff]  ;;  %v514_v7 = vshrl.u32 %v28_v2, 7  ;;  %v138_v8 = vld [vmem:[%s629_s2 + $0x10] sm:$0xff]  ;;  %v137_v10 = vld [vmem:[%s629_s2 + $0x8] sm:$0xff]  ;;  %v528_v11 = vand.u32 127, %v28_v2 }
   0x3   :  { %v139_v6 = vld [vmem:[%s629_s2 + $0x18] sm:$0xff]  ;;  %386 = vmatpush.msk.msra.mxu3 %vm196_vm0, %v66_v4  ;;  %v64_v9 = vld [vmem:[%s628_s1 + $0x50] sm:$0xff]  ;;  %380 = vmatpush.msk.msra.mxu1 %vm196_vm0, %v66_v4  ;;  %v25_v13 = vld [vmem:[%s627_s0 + $0x8] sm:$0xff] }
   0x4   :  { %165 = vmatpush.msra.mxu0 %v139_v6  ;;  %385 = vmatpush.msk.msra.mxu2 %vm196_vm0, %v66_v4  ;;  %v76_v12 = vand.u32 15, %v514_v7  ;;  %v24_v14 = vld [vmem:[%s627_s0] sm:$0xff]  ;;  %v63_v15 = vld [vmem:[%s628_s1 + $0x48] sm:$0xff] }
   0x5   :  { %388 = vmatpush.msra.mxu3 %v65_v5  ;;  %204 = vmatpush.msra.mxu1 %v65_v5  ;;  %v136_v16 = vld [vmem:[%s629_s2] sm:$0xff] }
   0x6   :  { %166 = vmatpush.msra.mxu0 %v138_v8  ;;  %387 = vmatpush.msra.mxu2 %v65_v5  ;;  %v120_v17 = vadd.s32 2, %v76_v12 }
   0x7   :  { %390 = vmatpush.msra.mxu3 %v64_v9 }
   0x8   :  { %167 = vmatpush.msra.mxu0 %v137_v10 }
   0x9   :  { %11 = vsyncpa [#allocation3], 0  ;;  %v62_v18 = vld [vmem:[%s628_s1 + $0x40] sm:$0xff]  ;;  %205 = vmatpush.msra.mxu1 %v64_v9  ;;  %389 = vmatpush.msra.mxu2 %v64_v9  ;;  %vm124_vm1 = vcmp.eq.s32.totalorder %v528_v11, %v120_v17  ;;  %v459_v19 = vmov 0.0   ;;  %vm140_vm2 = vcmask 261120   ;;  %v61_v21 = vld [vmem:[%s628_s1 + $0x38] sm:$0xff] }
   0xa   :  { %392 = vmatpush.msra.mxu3 %v63_v15  ;;  %168 = vmatpush.msra.mxu0 %v136_v16  ;;  %v372_v20 = vsel %vm124_vm1, 1.0, %v459_v19  ;;  %v60_v22 = vld [vmem:[%s628_s1 + $0x30] sm:$0xff]  ;;  %v59_v23 = vld [vmem:[%s628_s1 + $0x28] sm:$0xff]  ;;  %v58_v24 = vld [vmem:[%s628_s1 + $0x20] sm:$0xff]  ;;  %v69_v28 = vadd.s32 8, %v514_v7  ;;  %v70_v33 = vadd.s32 16, %v514_v7 }
   0xb   :  { %34 = vperm.xlu0 %417, %v25_v13   ;;  %31 = vperm.xlu1 %418, %v24_v14   ;;  %v57_v25 = vld [vmem:[%s628_s1 + $0x18] sm:$0xff]  ;;  %v56_v26 = vld [vmem:[%s628_s1 + $0x10] sm:$0xff]  ;;  %v55_v27 = vld [vmem:[%s628_s1 + $0x8] sm:$0xff]  ;;  %v71_v37 = vadd.s32 24, %v514_v7  ;;  %vm183_vm6 = vcmask 818176   ;;  %vm234_vm11 = vcmask 523264  }
   0xc   :  { %394 = vmatpush.msra.mxu3 %v62_v18  ;;  %206 = vmatpush.msra.mxu1 %v63_v15  ;;  %v83_v29 = vand.u32 15, %v69_v28  ;;  %v54_v32 = vld [vmem:[%s628_s1] sm:$0xff]  ;;  %v90_v34 = vand.u32 15, %v70_v33  ;;  %v460_v6 = vmov 64.0   ;;  %s356_s19 = sshll.u32 %s633_s6, 4  ;;  %s462_s20 = smov 128   ;;  %s357_s19 = int_to_ptr.hbm [resolvable:$true] %s356_s19 }
   0xd   :  { %391 = vmatpush.msra.mxu2 %v63_v15  ;;  %376 = vmatmul.msk.f32.vlgmr.msra.gmra.mxu0 %vm140_vm2, %v372_v20  ;;  %v97_v38 = vand.u32 15, %v71_v37  ;;  %v419_v52 = vld [vmem:[%s630_s3] ss:$0 sm:$0xff]  ;;  %422 = vrcp.f32 %v460_v6  ;;  %s463_s21 = smov 8  }
   0xe   :  { %396 = vmatpush.msra.mxu3 %v61_v21  ;;  %207 = vmatpush.msra.mxu1 %v62_v18  ;;  %v121_v30 = vadd.s32 2, %v83_v29  ;;  %v122_v35 = vadd.s32 2, %v90_v34 }
   0xf   :  { %393 = vmatpush.msra.mxu2 %v62_v18  ;;  %v123_v39 = vadd.s32 2, %v97_v38 }
  0x10   :  { %398 = vmatpush.msra.mxu3 %v60_v22  ;;  %208 = vmatpush.msra.mxu1 %v61_v21  ;;  %vm125_vm3 = vcmp.eq.s32.totalorder %v528_v11, %v121_v30  ;;  %vm126_vm4 = vcmp.eq.s32.totalorder %v528_v11, %v122_v35 }
  0x11   :  { %395 = vmatpush.msra.mxu2 %v61_v21  ;;  %v373_v31 = vsel %vm125_vm3, 1.0, %v459_v19  ;;  %v374_v36 = vsel %vm126_vm4, 1.0, %v459_v19  ;;  %vm127_vm5 = vcmp.eq.s32.totalorder %v528_v11, %v123_v39 }
  0x12   :  { %400 = vmatpush.msra.mxu3 %v59_v23  ;;  %209 = vmatpush.msra.mxu1 %v60_v22  ;;  %v375_v40 = vsel %vm127_vm5, 1.0, %v459_v19 }
  0x13   :  { %397 = vmatpush.msra.mxu2 %v60_v22  ;;  %v423_v7 = vpop.eup %422 }
  0x14   :  { %402 = vmatpush.msra.mxu3 %v58_v24  ;;  %210 = vmatpush.msra.mxu1 %v59_v23  ;;  %v248_v8 = vmul.f32 64.0, %v423_v7  ;;  %vm252_vm12 = vweird.f32 %v423_v7 }
  0x15   :  { %399 = vmatpush.msra.mxu2 %v59_v23  ;;  %377 = vmatmul.msk.f32.gmra.mxu0 %vm140_vm2, %v373_v31 }
  0x16   :  { %404 = vmatpush.msra.mxu3 %v57_v25  ;;  %211 = vmatpush.msra.mxu1 %v58_v24  ;;  %v249_v9 = vsub.f32 1.0, %v248_v8 }
  0x17   :  { %401 = vmatpush.msra.mxu2 %v58_v24 }
  0x18   :  { %406 = vmatpush.msra.mxu3 %v56_v26  ;;  %212 = vmatpush.msra.mxu1 %v57_v25  ;;  %v250_v10 = vmul.f32 %v423_v7, %v249_v9 }
  0x19   :  { %403 = vmatpush.msra.mxu2 %v57_v25 }
  0x1a   :  { %408 = vmatpush.msra.mxu3 %v55_v27  ;;  %213 = vmatpush.msra.mxu1 %v56_v26 }
  0x1b   :  { %405 = vmatpush.msra.mxu2 %v56_v26 }
  0x1c   :  { %214 = vmatpush.msra.mxu1 %v55_v27  ;;  %410 = vmatpush.msra.mxu3 %v54_v32 }
  0x1d   :  { %407 = vmatpush.msra.mxu2 %v55_v27  ;;  %378 = vmatmul.msk.f32.gmra.mxu0 %vm140_vm2, %v374_v36 }
  0x1e   :  { %215 = vmatpush.msra.mxu1 %v54_v32 }
  0x1f   :  { %409 = vmatpush.msra.mxu2 %v54_v32 }
  0x25   :  { %379 = vmatmul.msk.f32.gmra.mxu0 %vm140_vm2, %v375_v40 }
  0x74   :  { %v41_v41 = vpop.permute.xlu1 %40  ;;  %v38_v42 = vpop.permute.xlu0 %37 }
  0x75   :  { %vm44_vm7 = vcmp.eq.s32.totalorder %v528_v11, %v38_v42  ;;  %vm45_vm8 = vcmp.eq.s32.totalorder %v528_v11, %v41_v41 }
  0x76   :  { %v370_v43 = vsel %vm44_vm7, 1.0, %v459_v19  ;;  %v371_v48 = vsel %vm45_vm8, 1.0, %v459_v19 }
  0x77   :  { %383 = vmatmul.msk.f32.vlgmr.msra.gmra.mxu3 %vm183_vm6, %v370_v43 }
  0x7d   :  { %v35_v44 = vpop.permute.xlu0 %34  ;;  %v32_v45 = vpop.permute.xlu1 %31 }
  0x7e   :  { %vm43_vm9 = vcmp.eq.s32.totalorder %v528_v11, %v35_v44  ;;  %vm42_vm10 = vcmp.eq.s32.totalorder %v528_v11, %v32_v45  ;;  %v251_v11 = vadd.f32 %v423_v7, %v250_v10 }
  0x7f   :  { %v369_v46 = vsel %vm43_vm9, 1.0, %v459_v19  ;;  %v368_v47 = vsel %vm42_vm10, 1.0, %v459_v19  ;;  %384 = vmatmul.msk.f32.gmra.mxu3 %vm183_vm6, %v371_v48 }
  0x80   :  { %381 = vmatmul.msk.f32.vlgmr.msra.gmra.mxu1 %vm183_vm6, %v368_v47  ;;  %382 = vmatmul.msk.f32.vlgmr.msra.gmra.mxu2 %vm183_vm6, %v369_v46  ;;  %v253_v12 = vsel %vm252_vm12, %v423_v7, %v251_v11 }
  0x8a   :  { %v170_v49 = vpop.f32.mrf.mxu0 }
  0x92   :  { %v173_v50 = vpop.f32.mrf.mxu0 }
  0x9a   :  { %v176_v51 = vpop.f32.mrf.mxu0 }
  0xa2   :  { %v179_v60 = vpop.f32.mrf.mxu0 }
  0xfa   :  { %v223_v53 = vpop.f32.mrf.mxu3 }
  0xfb   :  { %v224_v54 = vadd.f32 %v223_v53, %v176_v51  ;;  %v421_v53 = vld [vmem:[%s632_s5] ss:$0 sm:$0xff] }
  0xfd   :  { %v217_v55 = vpop.f32.mrf.mxu1  ;;  %v232_v57 = vadd.f32 %v419_v52, %v224_v54 }
  0xfe   :  { %v218_v56 = vadd.f32 %v217_v55, %v170_v49 }
  0xff   :  { %v241_v58 = vsel %vm234_vm11, %v232_v57, 0.0 }
 0x100   :  { %v230_v59 = vadd.f32 %v419_v52, %v218_v56  ;;  %242 = vadd.xlane.f32.xlu0 %v241_v58 }
 0x102   :  { %v235_v61 = vsel %vm234_vm11, %v230_v59, 0.0  ;;  %v226_v0 = vpop.f32.mrf.mxu3 }
 0x103   :  { %v220_v62 = vpop.f32.mrf.mxu2  ;;  %236 = vadd.xlane.f32.xlu2 %v235_v61  ;;  %v227_v1 = vadd.f32 %v226_v0, %v179_v60 }
 0x104   :  { %v221_v63 = vadd.f32 %v220_v62, %v173_v50  ;;  %v420_v50 = vld [vmem:[%s631_s4] ss:$0 sm:$0xff]  ;;  %s461_s4 = smov [#allocation2]  }
 0x105   :  { %v233_v3 = vadd.f32 %v419_v52, %v227_v1  ;;  %s354_s5 = sshll.u32 %s461_s4, 4  ;;  %s355_s5 = int_to_ptr.vmem [resolvable:$true] %s354_s5 }
 0x106   :  { %v231_v2 = vadd.f32 %v419_v52, %v221_v63 }
 0x107   :  { %v244_v4 = vsel %vm234_vm11, %v233_v3, 0.0 }
 0x108   :  { %245 = vadd.xlane.f32.xlu1 %v244_v4  ;;  %v238_v5 = vsel %vm234_vm11, %v231_v2, 0.0 }
 0x10b   :  { %239 = vadd.xlane.f32.xlu2 %v238_v5 }
 0x173   :  { %v243_v18 = vpop.xlane.xlu0 %242 }
 0x174   :  { %v256_v21 = vmul.f32 %v253_v12, %v243_v18 }
 0x176   :  { %v237_v13 = vpop.xlane.xlu2 %236  ;;  %v601_v24 = vsub.f32 %v232_v57, %v256_v21 }
 0x177   :  { %v254_v14 = vmul.f32 %v253_v12, %v237_v13 }
 0x178   :  { %v264_v28 = vmul.f32 %v601_v24, %v601_v24 }
 0x179   :  { %v258_v15 = vsub.f32 %v230_v59, %v254_v14 }
 0x17a   :  { %v272_v30 = vsel %vm234_vm11, %v264_v28, 0.0 }
 0x17b   :  { %v262_v16 = vmul.f32 %v258_v15, %v258_v15  ;;  %v246_v26 = vpop.xlane.xlu1 %245 }
 0x17c   :  { %v257_v27 = vmul.f32 %v253_v12, %v246_v26 }
 0x17d   :  { %v266_v17 = vsel %vm234_vm11, %v262_v16, 0.0 }
 0x17e   :  { %267 = vadd.xlane.f32.xlu2 %v266_v17  ;;  %v240_v19 = vpop.xlane.xlu2 %239  ;;  %v606_v29 = vsub.f32 %v233_v3, %v257_v27 }
 0x17f   :  { %v255_v20 = vmul.f32 %v253_v12, %v240_v19 }
 0x180   :  { %v265_v31 = vmul.f32 %v606_v29, %v606_v29 }
 0x181   :  { %v259_v22 = vsub.f32 %v231_v2, %v255_v20 }
 0x182   :  { %v275_v32 = vsel %vm234_vm11, %v265_v31, 0.0 }
 0x183   :  { %v263_v23 = vmul.f32 %v259_v22, %v259_v22 }
 0x185   :  { %v269_v25 = vsel %vm234_vm11, %v263_v23, 0.0 }
 0x186   :  { %270 = vadd.xlane.f32.xlu2 %v269_v25 }
 0x18e   :  { %273 = vadd.xlane.f32.xlu2 %v272_v30 }
 0x196   :  { %276 = vadd.xlane.f32.xlu2 %v275_v32 }
 0x1f1   :  { %v268_v33 = vpop.xlane.xlu2 %267 }
 0x1f2   :  { %v278_v34 = vmul.f32 %v268_v33, %v253_v12 }
 0x1f4   :  { %v282_v35 = vadd.f32 1e-05, %v278_v34 }
 0x1f6   :  { %424 = vrsqrt.f32 %v282_v35  ;;  %vm292_vm14 = vweird.f32 %v282_v35 }
 0x1f9   :  { %v271_v36 = vpop.xlane.xlu2 %270 }
 0x1fa   :  { %v279_v37 = vmul.f32 %v271_v36, %v253_v12 }
 0x1fc   :  { %v425_v38 = vpop.eup %424  ;;  %v283_v39 = vadd.f32 1e-05, %v279_v37 }
 0x1fd   :  { %v287_v40 = vmul.f32 %v425_v38, %v282_v35  ;;  %vm293_vm13 = vweird.f32 %v425_v38 }
 0x1fe   :  { %426 = vrsqrt.f32 %v283_v39  ;;  %vm294_vm15 = vmor %vm292_vm14, %vm293_vm13  ;;  %vm302_vm1 = vweird.f32 %v283_v39 }
 0x1ff   :  { %v288_v41 = vmul.f32 %v425_v38, %v287_v40 }
 0x201   :  { %v289_v42 = vmul.f32 0.5, %v288_v41  ;;  %v274_v43 = vpop.xlane.xlu2 %273 }
 0x202   :  { %v280_v44 = vmul.f32 %v274_v43, %v253_v12 }
 0x203   :  { %v290_v45 = vsub.f32 1.5, %v289_v42 }
 0x204   :  { %v427_v46 = vpop.eup %426  ;;  %v284_v47 = vadd.f32 1e-05, %v280_v44 }
 0x205   :  { %v291_v48 = vmul.f32 %v425_v38, %v290_v45  ;;  %v297_v49 = vmul.f32 %v427_v46, %v283_v39  ;;  %vm303_vm0 = vweird.f32 %v427_v46 }
 0x206   :  { %428 = vrsqrt.f32 %v284_v47  ;;  %vm304_vm2 = vmor %vm302_vm1, %vm303_vm0  ;;  %vm312_vm4 = vweird.f32 %v284_v47 }
 0x207   :  { %v295_v51 = vsel %vm294_vm15, %v425_v38, %v291_v48  ;;  %v298_v52 = vmul.f32 %v427_v46, %v297_v49 }
 0x208   :  { %v326_v54 = vmul.f32 %v295_v51, %v258_v15 }
 0x209   :  { %v299_v55 = vmul.f32 0.5, %v298_v52  ;;  %v277_v56 = vpop.xlane.xlu2 %276 }
 0x20a   :  { %v334_v57 = vmul.f32 %v420_v50, %v326_v54  ;;  %v281_v58 = vmul.f32 %v277_v56, %v253_v12 }
 0x20b   :  { %v300_v59 = vsub.f32 1.5, %v299_v55 }
 0x20c   :  { %v429_v60 = vpop.eup %428  ;;  %v342_v61 = vadd.f32 %v421_v53, %v334_v57  ;;  %v285_v62 = vadd.f32 1e-05, %v281_v58 }
 0x20d   :  { %v301_v63 = vmul.f32 %v427_v46, %v300_v59  ;;  %v307_v0 = vmul.f32 %v429_v60, %v284_v47  ;;  %vm313_vm3 = vweird.f32 %v429_v60 }
 0x20e   :  { %346 = vst.msk [vmem:[#allocation2] sm:$0xff] %vm234_vm11, %v342_v61  ;;  %430 = vrsqrt.f32 %v285_v62  ;;  %vm314_vm5 = vmor %vm312_vm4, %vm313_vm3  ;;  %vm322_vm7 = vweird.f32 %v285_v62 }
 0x20f   :  { %v305_v1 = vsel %vm304_vm2, %v427_v46, %v301_v63  ;;  %v308_v2 = vmul.f32 %v429_v60, %v307_v0 }
 0x210   :  { %v327_v3 = vmul.f32 %v305_v1, %v259_v22 }
 0x211   :  { %v309_v4 = vmul.f32 0.5, %v308_v2 }
 0x212   :  { %v335_v5 = vmul.f32 %v420_v50, %v327_v3 }
 0x213   :  { %v310_v6 = vsub.f32 1.5, %v309_v4 }
 0x214   :  { %v431_v7 = vpop.eup %430  ;;  %v343_v8 = vadd.f32 %v421_v53, %v335_v5 }
 0x215   :  { %v311_v9 = vmul.f32 %v429_v60, %v310_v6  ;;  %v317_v10 = vmul.f32 %v431_v7, %v285_v62  ;;  %vm323_vm6 = vweird.f32 %v431_v7 }
 0x216   :  { %347 = vst.msk [vmem:[#allocation2 + $0x8] sm:$0xff] %vm234_vm11, %v343_v8  ;;  %vm324_vm8 = vmor %vm322_vm7, %vm323_vm6 }
 0x217   :  { %v315_v11 = vsel %vm314_vm5, %v429_v60, %v311_v9  ;;  %v318_v12 = vmul.f32 %v431_v7, %v317_v10 }
 0x218   :  { %v328_v13 = vmul.f32 %v315_v11, %v601_v24 }
 0x219   :  { %v319_v14 = vmul.f32 0.5, %v318_v12 }
 0x21a   :  { %v336_v15 = vmul.f32 %v420_v50, %v328_v13 }
 0x21b   :  { %v320_v16 = vsub.f32 1.5, %v319_v14 }
 0x21c   :  { %v344_v17 = vadd.f32 %v421_v53, %v336_v15 }
 0x21d   :  { %v321_v18 = vmul.f32 %v431_v7, %v320_v16 }
 0x21e   :  { %348 = vst.msk [vmem:[#allocation2 + $0x10] sm:$0xff] %vm234_vm11, %v344_v17 }
 0x21f   :  { %v325_v19 = vsel %vm324_vm8, %v431_v7, %v321_v18 }
 0x220   :  { %v329_v20 = vmul.f32 %v325_v19, %v606_v29 }
 0x222   :  { %v337_v21 = vmul.f32 %v420_v50, %v329_v20 }
 0x224   :  { %v345_v22 = vadd.f32 %v421_v53, %v337_v21 }
 0x226   :  { %349 = vst.msk [vmem:[#allocation2 + $0x18] sm:$0xff] %vm234_vm11, %v345_v22 }
 0x227   :  { %362 = dma.vmem_to_hbm [thread:$0]  %s355_s5, 512, %s357_s19, [#allocation3], %s462_s20, %s462_s20, %s463_s21  }
 0x228   :  { %456 = dma.done.wait [#allocation3], 512  }
 0x229   :  { %457 = vsyncadd [#allocation3], 4294966784 }
 0x22a   :  { %367 = vsyncpa [#allocation3], 1 }

</bundles_post_ra>
